<compile_context>
chip_gen: v7x
topology: tpu7x:2x2x1
jax: 0.10.0
libtpu: 0.0.40
codegen_flags: <defaults>
</compile_context>

<pallas_src>
import math

import numpy as np
import jax
import jax.numpy as jnp
from jax.experimental import pallas as pl
from jax.experimental.pallas import tpu as pltpu


# ----------------------------------------------------------------------------
# Pallas kernel: one (batch element, pyramid scale) per grid step
# ----------------------------------------------------------------------------
def _ppm_kernel(x_ref, poolT_ref, w_ref, b_ref, upT_ref, o_ref):
    # x_ref:     (1, Cin, HW)      bf16   input feature map (flattened pixels)
    # poolT_ref: (HW, CPAD)        bf16   packed adaptive-avg-pool matrix (all scales)
    # w_ref:     (1, Cout, Cin)    bf16   1x1 conv weight, BN scale folded in
    # b_ref:     (1, Cout, 1)      f32    conv bias, BN shift folded in
    # upT_ref:   (1, CPAD, HW)     bf16   this scale's bilinear upsample matrix
    #                                     (rows outside this scale's segment are zero)
    # o_ref:     (1, Cout, HW)     f32    this scale's output channel block
    x = x_ref[0]                                                        # (Cin, HW)
    pooled = jnp.dot(x, poolT_ref[...],
                     preferred_element_type=jnp.float32)                # (Cin, CPAD)
    z = jnp.dot(w_ref[0], pooled.astype(jnp.bfloat16),
                preferred_element_type=jnp.float32)                     # (Cout, CPAD)
    y = jnp.maximum(z + b_ref[0], 0.0)                                  # bias+BN+ReLU (f32)
    o_ref[0, :, :] = jnp.dot(y.astype(jnp.bfloat16), upT_ref[0],
                             preferred_element_type=jnp.float32)        # (Cout, HW)


def ppm_forward(x_nchw, params):
    """Ppm.forward: NCHW input -> NCHW output with len(scales)*Cout channels."""
    N, Cin, H, W = x_nchw.shape
    HW = H * W
    poolT, w, b, upT = params["poolT"], params["w"], params["b"], params["upT"]
    K, Cout, _ = w.shape
    CPAD = poolT.shape[1]
    x_flat = x_nchw.reshape(N, Cin, HW).astype(jnp.bfloat16)

    out = pl.pallas_call(
        _ppm_kernel,
        out_shape=jax.ShapeDtypeStruct((N, K * Cout, HW), jnp.float32),
        grid=(N, K),
        in_specs=[
            pl.BlockSpec((1, Cin, HW), lambda n, k: (n, 0, 0)),     # per-batch input
            pl.BlockSpec((HW, CPAD), lambda n, k: (0, 0)),          # shared pool matrix
            pl.BlockSpec((1, Cout, Cin), lambda n, k: (k, 0, 0)),   # per-scale conv W
            pl.BlockSpec((1, Cout, 1), lambda n, k: (k, 0, 0)),     # per-scale bias
            pl.BlockSpec((1, CPAD, HW), lambda n, k: (k, 0, 0)),    # per-scale upsample
        ],
        out_specs=pl.BlockSpec((1, Cout, HW), lambda n, k: (n, k, 0)),
        compiler_params=pltpu.CompilerParams(
            dimension_semantics=("parallel", "parallel"),
            vmem_limit_bytes=32 * 1024 * 1024,
        ),
    )(x_flat, poolT, w, b, upT)
    return out.reshape(N, K * Cout, H, W)


# ----------------------------------------------------------------------------
# Static pooling / upsampling matrices (exact PyTorch semantics)
# ----------------------------------------------------------------------------
def _adaptive_avg_pool_matrix(out_size, in_size):
    """(out_size, in_size) matrix implementing AdaptiveAvgPool1d semantics."""
    P = np.zeros((out_size, in_size), np.float32)
    for i in range(out_size):
        start = (i * in_size) // out_size
        end = ((i + 1) * in_size + out_size - 1) // out_size  # ceil
        P[i, start:end] = 1.0 / (end - start)
    return P


def _bilinear_upsample_matrix(in_size, out_size):
    """(out_size, in_size) matrix for bilinear resize, align_corners=False."""
    U = np.zeros((out_size, in_size), np.float32)
    scale = in_size / out_size
    for o in range(out_size):
        src = max((o + 0.5) * scale - 0.5, 0.0)
        i0 = min(int(math.floor(src)), in_size - 1)
        i1 = i0 + 1 if i0 < in_size - 1 else i0
        l1 = src - i0
        U[o, i0] += 1.0 - l1
        U[o, i1] += l1
    return U


# ----------------------------------------------------------------------------
# Parameter init (deterministic, synthetic; BN eval-mode folded into conv)
# ----------------------------------------------------------------------------
def init_params(key, in_channels, out_channels, scales, H, W, eps=1e-5):
    K = len(scales)
    HW = H * W
    total_cells = sum(s * s for s in scales)          # 1+4+9+36 = 50
    CPAD = ((total_cells + 63) // 64) * 64            # pack all scales into 64 cells

    poolT = np.zeros((HW, CPAD), np.float32)          # shared, packed
    upT = np.zeros((K, CPAD, HW), np.float32)         # per-scale, zero outside segment
    off = 0
    for k, s in enumerate(scales):
        Ph = _adaptive_avg_pool_matrix(s, H)          # (s, H)
        Pw = _adaptive_avg_pool_matrix(s, W)          # (s, W)
        Uh = _bilinear_upsample_matrix(s, H)          # (H, s)
        Uw = _bilinear_upsample_matrix(s, W)          # (W, s)
        poolT[:, off:off + s * s] = np.einsum("ih,jw->hwij", Ph, Pw).reshape(HW, s * s)
        upT[k, off:off + s * s, :] = np.einsum("hi,wj->ijhw", Uh, Uw).reshape(s * s, HW)
        off += s * s

    ws, bs = [], []
    bound = 1.0 / math.sqrt(in_channels)  # Conv2d default init (kaiming_uniform a=sqrt(5))
    for _ in scales:
        key, kw, kb, k1, k2, k3, k4 = jax.random.split(key, 7)
        w = jax.random.uniform(kw, (out_channels, in_channels), jnp.float32, -bound, bound)
        b = jax.random.uniform(kb, (out_channels,), jnp.float32, -bound, bound)
        # BatchNorm2d (eval mode) synthetic running stats, folded into the conv.
        gamma = 1.0 + 0.1 * jax.random.normal(k1, (out_channels,), jnp.float32)
        beta = 0.1 * jax.random.normal(k2, (out_channels,), jnp.float32)
        mean = 0.1 * jax.random.normal(k3, (out_channels,), jnp.float32)
        var = jax.random.uniform(k4, (out_channels,), jnp.float32, 0.5, 1.5)
        bn_s = gamma / jnp.sqrt(var + eps)
        bn_t = beta - mean * bn_s
        ws.append(w * bn_s[:, None])              # fold BN scale into weight
        bs.append((b * bn_s + bn_t)[:, None])     # fold BN shift into bias
    return {
        "poolT": jnp.asarray(poolT, jnp.bfloat16),          # (HW, CPAD)
        "upT": jnp.asarray(upT, jnp.bfloat16),              # (K, CPAD, HW)
        "w": jnp.stack(ws).astype(jnp.bfloat16),            # (K, Cout, Cin)
        "b": jnp.stack(bs),                                  # (K, Cout, 1) f32
    }


# ----------------------------------------------------------------------------
# Pure-JAX reference (f32 math on the same folded weights) for correctness
# ----------------------------------------------------------------------------
def ppm_reference(x_nchw, params):
    N, Cin, H, W = x_nchw.shape
    x = x_nchw.reshape(N, Cin, H * W).astype(jnp.float32)
    poolT = params["poolT"].astype(jnp.float32)
    upT = params["upT"].astype(jnp.float32)
    w = params["w"].astype(jnp.float32)
    b = params["b"]
    K = w.shape[0]
    pooled = jnp.einsum("ncp,pq->ncq", x, poolT)                   # (N, Cin, CPAD)
    outs = []
    for k in range(K):
        z = jnp.einsum("oc,ncq->noq", w[k], pooled) + b[k][None]
        y = jnp.maximum(z, 0.0)
        outs.append(jnp.einsum("noq,qp->nop", y, upT[k]))
    return jnp.concatenate(outs, axis=1).reshape(N, -1, H, W)


# ----------------------------------------------------------------------------
if __name__ == "__main__":
    key = jax.random.PRNGKey(0)
    kx, kp = jax.random.split(key)

    N, Cin, H, W = 2, 4, 16, 16
    Cout, scales = 64, (1, 2, 3, 6)

    x = jax.random.normal(kx, (N, Cin, H, W), jnp.float32)  # NCHW, like PyTorch
    params = init_params(kp, Cin, Cout, scales, H, W)

    fwd = jax.jit(ppm_forward)
    out = fwd(x, params)
    jax.block_until_ready(out)

    assert out.shape == (N, len(scales) * Cout, H, W), out.shape
    assert bool(jnp.all(jnp.isfinite(out)))

    ref = ppm_reference(x, params)
    max_err = float(jnp.max(jnp.abs(out - ref)))
    # bf16 MXU operands vs. f32 reference: tolerance loosened per review.
    assert bool(jnp.allclose(out, ref, atol=3e-2, rtol=3e-2)), max_err

    print("KERNEL_OK")
</pallas_src>

<mosaic_0001>
module attributes {stable_mosaic.version = 11 : i64} {
  func.func @_ppm_kernel(%arg0: i32, %arg1: i32, %arg2: memref<1x4x256xbf16, #tpu.memory_space<vmem>>, %arg3: memref<256x64xbf16, #tpu.memory_space<vmem>>, %arg4: memref<1x64x4xbf16, #tpu.memory_space<vmem>>, %arg5: memref<1x64x1xf32, #tpu.memory_space<vmem>>, %arg6: memref<1x64x256xbf16, #tpu.memory_space<vmem>>, %arg7: memref<1x64x256xf32, #tpu.memory_space<vmem>>) attributes {dimension_semantics = [#tpu.dimension_semantics<parallel>, #tpu.dimension_semantics<parallel>], iteration_bounds = array<i64: 2, 4>, scalar_prefetch = 0 : i64, scratch_operands = 0 : i64, tpu.core_type = #tpu.core_type<tc>, window_params = [{transform_indices = @transform_0, window_bounds = array<i64: 1, 4, 256>}, {pipeline_mode = #tpu.pipeline_mode<synchronous>, transform_indices = @transform_1, window_bounds = array<i64: 256, 64>}, {transform_indices = @transform_2, window_bounds = array<i64: 1, 64, 4>}, {transform_indices = @transform_3, window_bounds = array<i64: 1, 64, 1>}, {transform_indices = @transform_4, window_bounds = array<i64: 1, 64, 256>}, {transform_indices = @transform_5, window_bounds = array<i64: 1, 64, 256>}]} {
    %c0 = arith.constant 0 : index
    %c0_0 = arith.constant 0 : index
    %c0_1 = arith.constant 0 : index
    %0 = vector.load %arg2[%c0, %c0_0, %c0_1] : memref<1x4x256xbf16, #tpu.memory_space<vmem>>, vector<1x4x256xbf16>
    %1 = vector.shape_cast %0 : vector<1x4x256xbf16> to vector<4x256xbf16>
    %c0_2 = arith.constant 0 : index
    %c0_3 = arith.constant 0 : index
    %2 = vector.load %arg3[%c0_2, %c0_3] : memref<256x64xbf16, #tpu.memory_space<vmem>>, vector<256x64xbf16>
    %cst = arith.constant dense<0.000000e+00> : vector<4x64xf32>
    %3 = tpu.matmul %1, %2, %cst {dimension_numbers = #tpu.dot_dimension_numbers<[1], [0], [0], [1], [0, 0, 1, 1], [], []>} : vector<4x256xbf16>, vector<256x64xbf16>, vector<4x64xf32> -> vector<4x64xf32>
    %c0_4 = arith.constant 0 : index
    %c0_5 = arith.constant 0 : index
    %c0_6 = arith.constant 0 : index
    %4 = vector.load %arg4[%c0_4, %c0_5, %c0_6] : memref<1x64x4xbf16, #tpu.memory_space<vmem>>, vector<1x64x4xbf16>
    %5 = vector.shape_cast %4 : vector<1x64x4xbf16> to vector<64x4xbf16>
    %6 = arith.truncf %3 : vector<4x64xf32> to vector<4x64xbf16>
    %cst_7 = arith.constant dense<0.000000e+00> : vector<64x64xf32>
    %7 = tpu.matmul %5, %6, %cst_7 {dimension_numbers = #tpu.dot_dimension_numbers<[1], [0], [0], [1], [0, 0, 1, 1], [], []>} : vector<64x4xbf16>, vector<4x64xbf16>, vector<64x64xf32> -> vector<64x64xf32>
    %c0_8 = arith.constant 0 : index
    %c0_9 = arith.constant 0 : index
    %c0_10 = arith.constant 0 : index
    %8 = vector.load %arg5[%c0_8, %c0_9, %c0_10] : memref<1x64x1xf32, #tpu.memory_space<vmem>>, vector<1x64x1xf32>
    %9 = vector.shape_cast %8 : vector<1x64x1xf32> to vector<64x1xf32>
    %10 = vector.broadcast %9 : vector<64x1xf32> to vector<64x64xf32>
    %11 = arith.addf %7, %10 : vector<64x64xf32>
    %cst_11 = arith.constant 0.000000e+00 : f32
    %12 = vector.broadcast %cst_11 : f32 to vector<64x64xf32>
    %13 = arith.maximumf %11, %12 : vector<64x64xf32>
    %14 = arith.truncf %13 : vector<64x64xf32> to vector<64x64xbf16>
    %c0_12 = arith.constant 0 : index
    %c0_13 = arith.constant 0 : index
    %c0_14 = arith.constant 0 : index
    %15 = vector.load %arg6[%c0_12, %c0_13, %c0_14] : memref<1x64x256xbf16, #tpu.memory_space<vmem>>, vector<1x64x256xbf16>
    %16 = vector.shape_cast %15 : vector<1x64x256xbf16> to vector<64x256xbf16>
    %cst_15 = arith.constant dense<0.000000e+00> : vector<64x256xf32>
    %17 = tpu.matmul %14, %16, %cst_15 {dimension_numbers = #tpu.dot_dimension_numbers<[1], [0], [0], [1], [0, 0, 1, 1], [], []>} : vector<64x64xbf16>, vector<64x256xbf16>, vector<64x256xf32> -> vector<64x256xf32>
    %c0_16 = arith.constant 0 : index
    %c0_17 = arith.constant 0 : index
    %c0_18 = arith.constant 0 : index
    %18 = vector.load %arg7[%c0_16, %c0_17, %c0_18] : memref<1x64x256xf32, #tpu.memory_space<vmem>>, vector<1x64x256xf32>
    %19 = vector.shape_cast %18 : vector<1x64x256xf32> to vector<64x256xf32>
    %20 = vector.shape_cast %17 : vector<64x256xf32> to vector<1x64x256xf32>
    tpu.vector_store %arg7[%c0_16, %c0_17, %c0_18], %20 {strides = array<i32>} : memref<1x64x256xf32, #tpu.memory_space<vmem>>, vector<1x64x256xf32>,
    return
  }
  func.func @transform_0(%arg0: i32, %arg1: i32) -> (i32, i32, i32) {
    %c0_i32 = arith.constant 0 : i32
    %c0_i32_0 = arith.constant 0 : i32
    %c0_i32_1 = arith.constant 0 : i32
    return %arg0, %c0_i32, %c0_i32_0 : i32, i32, i32
  }
  func.func @transform_1(%arg0: i32, %arg1: i32) -> (i32, i32) {
    %c0_i32 = arith.constant 0 : i32
    %c0_i32_0 = arith.constant 0 : i32
    %c0_i32_1 = arith.constant 0 : i32
    return %c0_i32, %c0_i32_0 : i32, i32
  }
  func.func @transform_2(%arg0: i32, %arg1: i32) -> (i32, i32, i32) {
    %c0_i32 = arith.constant 0 : i32
    %c0_i32_0 = arith.constant 0 : i32
    %c0_i32_1 = arith.constant 0 : i32
    return %arg1, %c0_i32, %c0_i32_0 : i32, i32, i32
  }
  func.func @transform_3(%arg0: i32, %arg1: i32) -> (i32, i32, i32) {
    %c0_i32 = arith.constant 0 : i32
    %c0_i32_0 = arith.constant 0 : i32
    %c0_i32_1 = arith.constant 0 : i32
    return %arg1, %c0_i32, %c0_i32_0 : i32, i32, i32
  }
  func.func @transform_4(%arg0: i32, %arg1: i32) -> (i32, i32, i32) {
    %c0_i32 = arith.constant 0 : i32
    %c0_i32_0 = arith.constant 0 : i32
    %c0_i32_1 = arith.constant 0 : i32
    return %arg1, %c0_i32, %c0_i32_0 : i32, i32, i32
  }
  func.func @transform_5(%arg0: i32, %arg1: i32) -> (i32, i32, i32) {
    %c0_i32 = arith.constant 0 : i32
    %c0_i32_0 = arith.constant 0 : i32
    return %arg0, %arg1, %c0_i32 : i32, i32, i32
  }
}

</mosaic_0001>

<bundles_post_ra>
// kernel: ppm_forward.1
= control target key start
LH: loop header
LB: loop body
LE: loop exit
PB: predicated region body
PF: predicated region fallthrough
CT: control target
= control target key end

     0   :  { %s1182_s18 = smov 0   ;;  %s1184_s19 = smov 0   ;;  %s1347_s0 = inlined_call_operand.vmem [shape: bf16[2,4,256], index: 0, kind: input, shape index: {}]   ;;  %s1348_s1 = inlined_call_operand.vmem [shape: bf16[256,64], index: 1, kind: input, shape index: {}]   ;;  %s1349_s2 = inlined_call_operand.vmem [shape: bf16[4,64,4], index: 2, kind: input, shape index: {}]   ;;  %s1350_s3 = inlined_call_operand.vmem [shape: f32[4,64,1], index: 3, kind: input, shape index: {}]   ;;  %s1351_s4 = inlined_call_operand.vmem [shape: bf16[4,64,256], index: 4, kind: input, shape index: {}]   ;;  %s1352_s5 = inlined_call_operand.vmem [shape: f32[2,256,256], index: 5, kind: output, shape index: {}]  }
   0x1   :  { %s1186_s20 = smov 0   ;;  %s1188_s21 = smov 0  }
   0x2   :  { %s1190_s22 = smov 0  }
   0x3 LB: > { %s24_s23 = sadd.s32 1, %s1141_s20  ;;  %s27_s24 = sadd.s32 1, %s1145_s21  ;;  %s1149_s22 = sphi %s1190_s22, %s15_s22   ;;  %s1145_s21 = sphi %s1188_s21, %s1356_s21   ;;  %s1141_s20 = sphi %s1186_s20, %s1355_s20   ;;  %s1137_s19 = sphi %s1184_s19, %s1354_s19   ;;  %s1133_s18 = sphi %s1182_s18, %s1353_s18  }
   0x4   : > { %p25_p0 = scmp.ge.s32.totalorder %s24_s23, 4  ;;  %p942_p1 = scmp.ge.s32.totalorder %s1149_s22, 1 }
   0x5   : > { %p231_p2 = scmp.lt.s32.totalorder %s1149_s22, 9 }
   0x6   : > { %s1358_s23 = smov (%p25_p0, %s24_s23), 0  ;;  %s1360_s24 = smov (!%p25_p0, %s27_s24), %s1145_s21 }
   0x7   : > { %p232_p3 = pnand %p942_p1, %p231_p2  ;;  %p29_p4 = scmp.ge.s32.totalorder %s1360_s24, 2 }
   0x8   : > { %v1079_v0 = vld [vmem:[%s1348_s1 + $0x40] sm:$0xff] (!%p232_p3)   ;;  %v1081_v2 = vld [vmem:[%s1348_s1 + $0x48] sm:$0xff] (!%p232_p3)   ;;  %p279_p5 = scmp.lt.s32.totalorder (!%p232_p3), %s1137_s19, 1  ;;  %v1083_v4 = vld [vmem:[%s1348_s1 + $0x50] sm:$0xff] (!%p232_p3)   ;;  %p284_p6 = scmp.lt.s32.totalorder (!%p232_p3), %s1133_s18, 3  ;;  %vm568_vm0 = vcmask (!%p232_p3), 31744  }
   0x9   : > { %s1362_s24 = smov (%p29_p4, %s1360_s24), 0  ;;  %235 = sbr.rel (%p232_p3) target bundleno = 724 (0x2d4), region = 40 }
   0xa   : > { %v1080_v1 = vld [vmem:[%s1348_s1] sm:$0xff] (!%p232_p3)   ;;  %998 = vmatprep.subr.bf16.mxu0 (!%p232_p3), %v1079_v0  ;;  %v1082_v3 = vld [vmem:[%s1348_s1 + $0x8] sm:$0xff] (!%p232_p3)   ;;  %v1084_v5 = vld [vmem:[%s1348_s1 + $0x10] sm:$0xff] (!%p232_p3)   ;;  %v1151_v19 = vmov (!%p232_p3), 0   ;;  %vm581_vm1 = vcmask (!%p232_p3), 1041408   ;;  %vm710_vm2 = vcmask (!%p232_p3), 523264  }
   0xb   : > { %999 = vmatpush3.bf16.msra.mxu0 (!%p232_p3), %v1080_v1  ;;  %v1085_v6 = vld [vmem:[%s1348_s1 + $0x58] sm:$0xff] (!%p232_p3)   ;;  %v1087_v8 = vld [vmem:[%s1348_s1 + $0x60] sm:$0xff] (!%p232_p3)   ;;  %v1089_v10 = vld [vmem:[%s1348_s1 + $0x68] sm:$0xff] (!%p232_p3)   ;;  %1077 = vset.pattern.permute.xlu0 (!%p232_p3), %v1151_v19  ;;  %s951_s12 = sshll.u32 (!%p232_p3), %s1133_s18, 3 }
   0xc   : > { %1000 = vmatprep.subr.bf16.mxu0 (!%p232_p3), %v1081_v2  ;;  %v1086_v7 = vld [vmem:[%s1348_s1 + $0x18] sm:$0xff] (!%p232_p3)   ;;  %v1088_v9 = vld [vmem:[%s1348_s1 + $0x20] sm:$0xff] (!%p232_p3)   ;;  %v1090_v13 = vld [vmem:[%s1348_s1 + $0x28] sm:$0xff] (!%p232_p3)   ;;  %1078 = vset.pattern.permute.xlu1 (!%p232_p3), %v1151_v19  ;;  %p302_p7 = scmp.lt.s32.totalorder (!%p232_p3), %s951_s12, 31 }
   0xd   : > { %v1091_v14 = vld [vmem:[%s1348_s1 + $0x70] sm:$0xff] (!%p232_p3)   ;;  %v1093_v16 = vld [vmem:[%s1348_s1 + $0x78] sm:$0xff] (!%p232_p3)  }
   0xe   : > { %v1092_v15 = vld [vmem:[%s1348_s1 + $0x30] sm:$0xff] (!%p232_p3)   ;;  %v1094_v17 = vld [vmem:[%s1348_s1 + $0x38] sm:$0xff] (!%p232_p3)  }
   0xf   : > { %1001 = vmatpush3.bf16.msra.mxu0 (!%p232_p3), %v1082_v3 }
  0x10   : > { %s1364_s19 = smov (!%p279_p5, %s1137_s19), 1  ;;  %1002 = vmatprep.subr.bf16.mxu0 %v1083_v4  ;;  %s1366_s12 = smov (!%p302_p7, %s951_s12), 31 }
  0x11   : > { %s994_s14 = sshll.u32 %s1364_s19, 2  ;;  %s952_s13 = sshll.u32 %s1366_s12, 1 }
  0x12   : > { %s283_s28 = scalar_lea.vmem %s1347_s0, %s994_s14  ;;  %s953_s14 = sshll.u32 %s1364_s19, 6 }
  0x13   : > { %1003 = vmatpush3.bf16.msra.mxu0 %v1084_v5  ;;  %v955_v11 = vld.sshfl [vmem:[%s283_s28] sm:$0x33 pattern:$0x76325410]  ;;  %s285_s25 = scalar_select %p284_p6, %s1133_s18, 3 }
  0x14   : > { %1004 = vmatprep.subr.bf16.mxu0 %v1085_v6  ;;  %v352_v12 = vcombine.high %v955_v11, %v955_v11  ;;  %s306_s15 = sadd.s32 %s953_s14, %s952_s13 }
  0x15   : > { %s995_s26 = sshll.u32 %s285_s25, 5  ;;  %s996_s30 = sshll.u32 %s285_s25, 6 }
  0x16   : > { %483 = vmatprep.mubr.bf16.mxu0 %v352_v12  ;;  %s1273_s29 = scalar_lea.vmem %s1349_s2, %s995_s26  ;;  %s293_s8 = scalar_lea.vmem %s1350_s3, %s996_s30 }
  0x17   : > { %1005 = vmatpush3.bf16.msra.mxu0 %v1086_v7  ;;  %v1095_v18 = vld [vmem:[%s1273_s29] sm:$0xff]   ;;  %v502_v21 = vld [vmem:[%s293_s8 + $0x10] sm:$0xff]  ;;  %s1285_s11 = scalar_lea.vmem %s1351_s4, %s996_s30  ;;  %v501_v22 = vld [vmem:[%s293_s8 + $0x8] sm:$0xff]  ;;  %s954_s16 = sshll.u32 %s306_s15, 3 }
  0x18   : > { %1006 = vmatprep.subr.bf16.mxu0 %v1087_v8  ;;  %1027 = vmatprep.mubr.msk.bf16.mxu1 %vm568_vm0, %v1095_v18  ;;  %v500_v20 = vld [vmem:[%s293_s8] sm:$0xff]  ;;  %v503_v23 = vld [vmem:[%s293_s8 + $0x18] sm:$0xff]  ;;  %v505_v25 = vld [vmem:[%s293_s8 + $0x28] sm:$0xff]  ;;  %s1314_s26 = scalar_lea.vmem %s1352_s5, %s954_s16 }
  0x19   : > { %510 = vperm.xlu0 %1077, %v500_v20   ;;  %520 = vperm.xlu1 %1078, %v502_v21   ;;  %v504_v24 = vld [vmem:[%s293_s8 + $0x20] sm:$0xff]  ;;  %v506_v26 = vld [vmem:[%s293_s8 + $0x30] sm:$0xff]  ;;  %v507_v27 = vld [vmem:[%s293_s8 + $0x38] sm:$0xff] }
  0x1a   : > { %v1101_v34 = vld [vmem:[%s1285_s11 + $0x4] ss:$8 sps:$4 sm:$0xff]   ;;  %v1097_v37 = vld [vmem:[%s1273_s29 + $0x10] sm:$0xff]   ;;  %v1099_v38 = vld [vmem:[%s1285_s11] ss:$8 sps:$4 sm:$0xff]  }
  0x1b   : > { %1007 = vmatpush3.bf16.msra.mxu0 %v1088_v9  ;;  %v1096_v36 = vld [vmem:[%s1273_s29 + $0x8] sm:$0xff]   ;;  %v1104_v39 = vld [vmem:[%s1285_s11 + $0x14] ss:$8 sps:$4 sm:$0xff]   ;;  %v1102_v40 = vld [vmem:[%s1285_s11 + $0x10] ss:$8 sps:$4 sm:$0xff]  }
  0x1c   : > { %1008 = vmatprep.subr.bf16.mxu0 %v1089_v10  ;;  %v1098_v41 = vld [vmem:[%s1273_s29 + $0x18] sm:$0xff]   ;;  %v1107_v42 = vld [vmem:[%s1285_s11 + $0x24] ss:$8 sps:$4 sm:$0xff]   ;;  %v1105_v43 = vld [vmem:[%s1285_s11 + $0x20] ss:$8 sps:$4 sm:$0xff]  }
  0x1d   : > { %515 = vperm.xlu0 %1077, %v501_v22   ;;  %525 = vperm.xlu1 %1078, %v503_v23   ;;  %v1110_v44 = vld [vmem:[%s1285_s11 + $0x34] ss:$8 sps:$4 sm:$0xff]   ;;  %v1108_v45 = vld [vmem:[%s1285_s11 + $0x30] ss:$8 sps:$4 sm:$0xff]  }
  0x1f   : > { %1009 = vmatpush3.bf16.msra.mxu0 %v1090_v13 }
  0x20   : > { %1010 = vmatprep.subr.bf16.mxu0 %v1091_v14 }
  0x21   : > { %530 = vperm.xlu0 %1077, %v504_v24   ;;  %535 = vperm.xlu1 %1078, %v505_v25  }
  0x23   : > { %1011 = vmatpush3.bf16.msra.mxu0 %v1092_v15 }
  0x24   : > { %1012 = vmatprep.subr.bf16.mxu0 %v1093_v16 }
  0x25   : > { %540 = vperm.xlu0 %1077, %v506_v26   ;;  %545 = vperm.xlu1 %1078, %v507_v27  }
  0x27   : > { %1013 = vmatpush3.bf16.msra.mxu0 %v1094_v17 }
  0x2a   : > { %484 = vmatmul.mubr.bf16.vlgmr.msra.gmra.mrb[0].mxu0 %v955_v11 }
  0x98   : > { %v511_v46 = vpop.permute.xlu0 %510  ;;  %v521_v47 = vpop.permute.xlu1 %520 }
  0x9c   : > { %v516_v48 = vpop.permute.xlu0 %515  ;;  %v526_v49 = vpop.permute.xlu1 %525 }
  0xa0   : > { %v531_v53 = vpop.permute.xlu0 %530  ;;  %v536_v58 = vpop.permute.xlu1 %535 }
  0xa4   : > { %v541_v1 = vpop.permute.xlu0 %540  ;;  %v546_v6 = vpop.permute.xlu1 %545 }
  0xfd   : > { %v1014_v28 = vpop.f32.mrb[0].mxu0 }
  0xfe   : > { %v1015_v29 = vpop.f32.mrb[1].mxu0 }
  0xff   : > { %v1016_v30 = vadd.f32 %v1015_v29, %v1014_v28  ;;  %v1017_v31 = vpop.f32.mrb[2].mxu0 }
 0x100   : > { %v1018_v32 = vpop.f32.mrb[3].mxu0 }
 0x101   : > { %v499_v33 = vpack.c.bf16 %v1016_v30, %v1016_v30 }
 0x103   : > { %1035 = vmatprep.subr.msk.bf16.mxu1 %vm581_vm1, %v499_v33  ;;  %v583_v35 = vsel %vm581_vm1, %v499_v33, 0 }
 0x104   : > { %1026 = vmatpush3.bf16.msra.mxu1 %v583_v35 }
 0x105   : > { %723 = vmatprep.subr.bf16.mxu1 %v1101_v34 }
 0x107   : > { %1028 = vmatmul.mubr.msk.bf16.vlgmr.msra.gmra.mrb[0].mxu1 %vm568_vm0, %v1096_v36 }
 0x108   : > { %1031 = vmatprep.mubr.msk.bf16.mxu1 %vm568_vm0, %v1097_v37  ;;  %724 = vmatpush1.bf16.msra.mxu1 %v1099_v38 }
 0x109   : > { %725 = vmatprep.subr.bf16.mxu1 %v1104_v39 }
 0x10c   : > { %726 = vmatpush1.bf16.msra.mxu1 %v1102_v40 }
 0x10d   : > { %727 = vmatprep.subr.bf16.mxu1 %v1107_v42 }
 0x10f   : > { %1032 = vmatmul.mubr.msk.bf16.gmra.mrb[4].mxu1 %vm568_vm0, %v1098_v41 }
 0x110   : > { %755 = vmatprep.mubr.bf16.mxu1 %v1151_v19  ;;  %728 = vmatpush1.bf16.msra.mxu1 %v1105_v43 }
 0x111   : > { %729 = vmatprep.subr.bf16.mxu1 %v1110_v44 }
 0x114   : > { %730 = vmatpush1.bf16.msra.mxu1 %v1108_v45 }
 0x1da   : > { %v1029_v50 = vpop.f32.mrb[0].mxu1 }
 0x1db   : > { %v628_v51 = vadd.f32 %v1029_v50, %v521_v47  ;;  %v619_v52 = vpop.f32.mrb[1].mxu1 }
 0x1dc   : > { %v620_v54 = vadd.f32 %v619_v52, %v511_v46  ;;  %v1030_v55 = vpop.f32.mrb[2].mxu1 }
 0x1dd   : > { %v631_v56 = vadd.f32 %v1030_v55, %v526_v49  ;;  %v622_v57 = vpop.f32.mrb[3].mxu1  ;;  %v652_v60 = vmax.f32 %v628_v51, 0.0 }
 0x1de   : > { %v623_v59 = vadd.f32 %v622_v57, %v516_v48  ;;  %v650_v62 = vmax.f32 %v620_v54, 0.0 }
 0x1df   : > { %v653_v61 = vmax.f32 %v631_v56, 0.0 }
 0x1e0   : > { %v651_v63 = vmax.f32 %v623_v59, 0.0 }
 0x1e1   : > { %v659_v0 = vpack.c.bf16 %v653_v61, %v652_v60 }
 0x1e2   : > { %v658_v2 = vpack.c.bf16 %v651_v63, %v650_v62  ;;  %v1033_v3 = vpop.f32.mrb[4].mxu1 }
 0x1e3   : > { %v644_v4 = vadd.f32 %v1033_v3, %v541_v1  ;;  %v635_v5 = vpop.f32.mrb[5].mxu1 }
 0x1e4   : > { %v636_v7 = vadd.f32 %v635_v5, %v531_v53  ;;  %v1034_v8 = vpop.f32.mrb[6].mxu1  ;;  %988 = vmatmul.mubr.msk.bf16.vlgmr.msra.gmra.mrb[8].mxu1 %vm710_vm2, %v658_v2 }
 0x1e5   : > { %v647_v9 = vadd.f32 %v1034_v8, %v546_v6  ;;  %v638_v10 = vpop.f32.mrb[7].mxu1  ;;  %765 = vmatprep.mubr.bf16.mxu1 %v1151_v19  ;;  %v656_v12 = vmax.f32 %v644_v4, 0.0 }
 0x1e6   : > { %v639_v11 = vadd.f32 %v638_v10, %v536_v58  ;;  %v654_v14 = vmax.f32 %v636_v7, 0.0 }
 0x1e7   : > { %v657_v13 = vmax.f32 %v647_v9, 0.0 }
 0x1e8   : > { %v655_v15 = vmax.f32 %v639_v11, 0.0 }
 0x1e9   : > { %v661_v16 = vpack.c.bf16 %v657_v13, %v656_v12 }
 0x1ea   : > { %v660_v17 = vpack.c.bf16 %v655_v15, %v654_v14 }
 0x1ec   : > { %989 = vmatmul.mubr.msk.bf16.gmra.mrb[12].mxu1 %vm710_vm2, %v659_v0 }
 0x1ed   : > { %775 = vmatprep.mubr.bf16.mxu1 %v1151_v19 }
 0x1f4   : > { %990 = vmatmul.mubr.msk.bf16.gmra.mrb[16].mxu1 %vm710_vm2, %v660_v17 }
 0x1f5   : > { %785 = vmatprep.mubr.bf16.mxu1 %v1151_v19 }
 0x1fc   : > { %991 = vmatmul.mubr.msk.bf16.gmra.mrb[20].mxu1 %vm710_vm2, %v661_v16 }
 0x2b7   : > { %v757_v18 = vpop.f32.mrb[8].mxu1 }
 0x2b8   : > { %796 = vst [vmem:[%s1314_s26] sm:$0xff] %v757_v18  ;;  %v759_v19 = vpop.f32.mrb[9].mxu1 }
 0x2b9   : > { %797 = vst [vmem:[%s1314_s26 + $0x8] sm:$0xff] %v759_v19  ;;  %v761_v20 = vpop.f32.mrb[10].mxu1 }
 0x2ba   : > { %798 = vst [vmem:[%s1314_s26 + $0x10] sm:$0xff] %v761_v20  ;;  %v763_v21 = vpop.f32.mrb[11].mxu1 }
 0x2bb   : > { %799 = vst [vmem:[%s1314_s26 + $0x18] sm:$0xff] %v763_v21 }
 0x2bf   : > { %v767_v22 = vpop.f32.mrb[12].mxu1 }
 0x2c0   : > { %800 = vst [vmem:[%s1314_s26 + $0x20] sm:$0xff] %v767_v22  ;;  %v769_v23 = vpop.f32.mrb[13].mxu1 }
 0x2c1   : > { %801 = vst [vmem:[%s1314_s26 + $0x28] sm:$0xff] %v769_v23  ;;  %v771_v24 = vpop.f32.mrb[14].mxu1 }
 0x2c2   : > { %802 = vst [vmem:[%s1314_s26 + $0x30] sm:$0xff] %v771_v24  ;;  %v773_v25 = vpop.f32.mrb[15].mxu1 }
 0x2c3   : > { %803 = vst [vmem:[%s1314_s26 + $0x38] sm:$0xff] %v773_v25 }
 0x2c7   : > { %v777_v26 = vpop.f32.mrb[16].mxu1 }
 0x2c8   : > { %804 = vst [vmem:[%s1314_s26 + $0x40] sm:$0xff] %v777_v26  ;;  %v779_v27 = vpop.f32.mrb[17].mxu1 }
 0x2c9   : > { %805 = vst [vmem:[%s1314_s26 + $0x48] sm:$0xff] %v779_v27  ;;  %v781_v28 = vpop.f32.mrb[18].mxu1 }
 0x2ca   : > { %806 = vst [vmem:[%s1314_s26 + $0x50] sm:$0xff] %v781_v28  ;;  %v783_v29 = vpop.f32.mrb[19].mxu1 }
 0x2cb   : > { %807 = vst [vmem:[%s1314_s26 + $0x58] sm:$0xff] %v783_v29 }
 0x2cf   : > { %v787_v30 = vpop.f32.mrb[20].mxu1 }
 0x2d0   : > { %808 = vst [vmem:[%s1314_s26 + $0x60] sm:$0xff] %v787_v30  ;;  %v789_v31 = vpop.f32.mrb[21].mxu1 }
 0x2d1   : > { %809 = vst [vmem:[%s1314_s26 + $0x68] sm:$0xff] %v789_v31  ;;  %v791_v32 = vpop.f32.mrb[22].mxu1 }
 0x2d2   : > { %810 = vst [vmem:[%s1314_s26 + $0x70] sm:$0xff] %v791_v32  ;;  %v793_v33 = vpop.f32.mrb[23].mxu1 }
 0x2d3   : > { %811 = vst [vmem:[%s1314_s26 + $0x78] sm:$0xff] %v793_v33 }
 0x2d4 PF: > { %s15_s22 = sadd.s32 1, %s1149_s22   ;;  %s1353_s18 = smov %s1141_s20 }
 0x2d5   : > { %p12_p8 = scmp.ge.s32.totalorder %s15_s22, 10   ;;  %s1354_s19 = smov %s1145_s21 }
 0x2d6   : > { %s1355_s20 = smov %s1358_s23  ;;  %s1356_s21 = smov %s1362_s24 }
 0x2d7   :  { %14 = sbr.rel (!%p12_p8) target bundleno = 3 (0x3), region = 79 }

</bundles_post_ra>
